<compile_context>
chip_gen: v7x
topology: tpu7x:2x2x1
jax: 0.10.0
libtpu: 0.0.40
codegen_flags: <defaults>
</compile_context>

<pallas_src>
import functools

import jax
import jax.numpy as jnp
from jax.experimental import pallas as pl
from jax.experimental.pallas import tpu as pltpu

C_IN, C_MID, C_OUT, K = 3, 16, 3, 3
C_IN_PAD = 8  # pad input channels 3 -> 8 so the conv1 dot has a sublane-aligned K


def _encoder_kernel(H, W, x_ref, m_ref, w1_ref, b1_ref, w2_ref, b2_ref, o_ref):
    # x_ref : (n_img, C_IN, hw)      flattened-NCHW input block
    # m_ref : (9, hw)                f32 edge-validity mask per tap (1 = neighbor in bounds)
    # w1_ref: (9, C_MID, C_IN_PAD)   conv1 weights, tap-major, channel-padded columns
    # b1_ref: (C_MID, 1)
    # w2_ref: (9, C_OUT, C_MID)      conv2 weights, tap-major
    # b2_ref: (C_OUT, 1)
    # o_ref : (n_img, C_OUT, hw)     flattened-NCHW output block (lane-dense stores)
    n_img = o_ref.shape[0]
    hw = H * W

    # Tap order matches the (kh, kw) weight/mask order: t = (di+1)*3 + (dj+1).
    shifts = [di * W + dj for di in (-1, 0, 1) for dj in (-1, 0, 1)]

    masks = m_ref[...]                                       # (9, hw)
    w1 = w1_ref[...]                                         # (9, C_MID, C_IN_PAD)
    w2 = w2_ref[...]                                         # (9, C_OUT, C_MID)
    b1 = b1_ref[...]                                         # (C_MID, 1)
    b2 = b2_ref[...]                                         # (C_OUT, 1)
    mask_rows = [masks[t:t + 1, :] for t in range(K * K)]    # each (1, hw)

    def tap_roll(a, s):
        # a[:, (p + s) % hw] — XLU lane rotation (pltpu.roll follows the jnp.roll convention,
        # hence the negated, normalized shift).
        if s == 0:
            return a
        return pltpu.roll(a, (-s) % hw, axis=1)

    zero_pad = jnp.zeros((C_IN_PAD - C_IN, hw), jnp.float32)

    for b in range(n_img):
        # Channel-major pixels for this image; pad 3 -> 8 rows once (sublane-aligned K=8).
        x = jnp.concatenate([x_ref[b], zero_pad], axis=0)    # (C_IN_PAD, hw)

        # ---- conv1 + bias + ReLU: 9-tap accumulation, mask applied on the input side ----
        h = None
        for t, s in enumerate(shifts):
            xm = tap_roll(x, s) * mask_rows[t]                                  # (8, hw)
            c = jnp.dot(w1[t], xm, preferred_element_type=jnp.float32)          # (16, hw)
            h = c if h is None else h + c
        h = jnp.maximum(h + b1, 0.0)                                            # (16, hw)

        # ---- conv2 + bias: 9-tap accumulation, mask applied on the 3-row output side ----
        # (mask is per output pixel, the dot mixes channels only, so post-dot masking is exact)
        y = None
        for t, s in enumerate(shifts):
            c = jnp.dot(w2[t], tap_roll(h, s),
                        preferred_element_type=jnp.float32) * mask_rows[t]      # (3, hw)
            y = c if y is None else y + c
        o_ref[b] = (y + b2).astype(o_ref.dtype)                                 # (3, hw)


def _pick_imgs_per_step(B, hw, *, pixel_budget=65536, max_imgs=8):
    """Images per grid step: keep per-step pixels within a VMEM budget (sized for v7x's
    64 MiB/TC), keep the Python unroll small, and ensure >= 2 grid steps when B >= 2 so
    both v7x TensorCores get 'parallel' work."""
    cap = max(1, min(pixel_budget // max(hw, 1), max_imgs, B))
    if B >= 2:
        cap = max(1, min(cap, B // 2))
    n = cap
    while B % n:
        n -= 1
    return n


def encoder_no_forward(x_nchw, w1, b1, w2, b2, *, imgs_per_step=None):
    """x_nchw: (B, 3, H, W) f32; w1/w2 in PyTorch (Cout, Cin, kh, kw) layout; b1/b2 1-D."""
    B, C, H, W = x_nchw.shape
    assert C == C_IN, f"Encoder_no expects {C_IN} input channels, got {C}"
    hw = H * W
    assert hw % 128 == 0, "H*W must be a multiple of 128 for lane-dense tiles"

    n_img = imgs_per_step if imgs_per_step is not None else _pick_imgs_per_step(B, hw)
    assert B % n_img == 0
    grid = (B // n_img,)

    # Free reshape of NCHW: per image the data is already channel-major over flat pixels.
    x_flat = x_nchw.reshape(B, C_IN, hw).astype(jnp.float32)

    # Tap-major weights: w*_taps[t] = w[:, :, kh, kw] with t = kh*3 + kw; pad conv1's input
    # channels 3 -> 8 with zero columns (matches the in-kernel zero rows).
    w1_taps = jnp.transpose(w1, (2, 3, 0, 1)).reshape(K * K, C_MID, C_IN)
    w1_taps = jnp.pad(w1_taps, ((0, 0), (0, 0), (0, C_IN_PAD - C_IN))).astype(jnp.float32)
    w2_taps = jnp.transpose(w2, (2, 3, 0, 1)).reshape(K * K, C_OUT, C_MID).astype(jnp.float32)
    b1_col = b1.reshape(C_MID, 1).astype(jnp.float32)
    b2_col = b2.reshape(C_OUT, 1).astype(jnp.float32)

    # Precomputed edge-validity masks (one H*W row of lanes per tap); they also kill the
    # wrap-around of the circular lane roll at image borders.
    ii = jnp.arange(H, dtype=jnp.int32)[:, None]
    jj = jnp.arange(W, dtype=jnp.int32)[None, :]
    mask_list = []
    for di in (-1, 0, 1):
        for dj in (-1, 0, 1):
            valid = ((ii + di >= 0) & (ii + di < H) & (jj + dj >= 0) & (jj + dj < W))
            mask_list.append(valid.reshape(hw))
    masks = jnp.stack(mask_list, axis=0).astype(jnp.float32)          # (9, hw)

    # Per-step live-VMEM estimate: double-buffered in/out blocks + activations + masks.
    per_step = 4 * hw * (2 * 2 * n_img * (C_IN + C_OUT) + n_img * C_IN_PAD
                         + 3 * C_MID + C_OUT + K * K)
    vmem_limit = int(min(max(2 * per_step, 32 * 1024 * 1024), 64 * 1024 * 1024))

    out = pl.pallas_call(
        functools.partial(_encoder_kernel, H, W),
        out_shape=jax.ShapeDtypeStruct((B, C_OUT, hw), jnp.float32),
        grid_spec=pltpu.PrefetchScalarGridSpec(
            num_scalar_prefetch=0,
            grid=grid,
            in_specs=[
                pl.BlockSpec((n_img, C_IN, hw), lambda g: (g, 0, 0)),
                pl.BlockSpec((K * K, hw), lambda g: (0, 0)),
                pl.BlockSpec((K * K, C_MID, C_IN_PAD), lambda g: (0, 0, 0)),
                pl.BlockSpec((C_MID, 1), lambda g: (0, 0)),
                pl.BlockSpec((K * K, C_OUT, C_MID), lambda g: (0, 0, 0)),
                pl.BlockSpec((C_OUT, 1), lambda g: (0, 0)),
            ],
            out_specs=pl.BlockSpec((n_img, C_OUT, hw), lambda g: (g, 0, 0)),
        ),
        compiler_params=pltpu.CompilerParams(
            dimension_semantics=("parallel",),
            vmem_limit_bytes=vmem_limit,
        ),
    )(x_flat, masks, w1_taps, b1_col, w2_taps, b2_col)

    return out.reshape(B, C_OUT, H, W)   # already NCHW — reshape only, no transpose


def reference_forward(x_nchw, w1, b1, w2, b2):
    """Pure-JAX reference matching the PyTorch forward pass (NCHW / OIHW)."""
    dn = ("NCHW", "OIHW", "NCHW")
    y = jax.lax.conv_general_dilated(x_nchw, w1, (1, 1), ((1, 1), (1, 1)),
                                     dimension_numbers=dn)
    y = jax.nn.relu(y + b1.reshape(1, -1, 1, 1))
    y = jax.lax.conv_general_dilated(y, w2, (1, 1), ((1, 1), (1, 1)),
                                     dimension_numbers=dn)
    return y + b2.reshape(1, -1, 1, 1)


if __name__ == "__main__":
    key = jax.random.PRNGKey(0)
    k_x, k_w1, k_b1, k_w2, k_b2 = jax.random.split(key, 5)

    # deterministic synthetic parameters (PyTorch-style uniform fan-in init)
    bound1 = 1.0 / float((C_IN * K * K) ** 0.5)
    w1 = jax.random.uniform(k_w1, (C_MID, C_IN, K, K), jnp.float32, -bound1, bound1)
    b1 = jax.random.uniform(k_b1, (C_MID,), jnp.float32, -bound1, bound1)
    bound2 = 1.0 / float((C_MID * K * K) ** 0.5)
    w2 = jax.random.uniform(k_w2, (C_OUT, C_MID, K, K), jnp.float32, -bound2, bound2)
    b2 = jax.random.uniform(k_b2, (C_OUT,), jnp.float32, -bound2, bound2)

    # small NCHW input consistent with the module (3 input channels required)
    x = jax.random.normal(k_x, (2, 3, 16, 16), jnp.float32)

    out = jax.block_until_ready(encoder_no_forward(x, w1, b1, w2, b2))
    assert out.shape == (2, 3, 16, 16), out.shape

    ref = reference_forward(x, w1, b1, w2, b2)
    max_err = float(jnp.max(jnp.abs(out - ref)))
    assert max_err < 1e-4, f"max abs error vs reference: {max_err}"  # all-f32 path

    print("KERNEL_OK")
</pallas_src>

<mosaic_0001>
module attributes {stable_mosaic.version = 11 : i64} {
  func.func @_encoder_kernel(%arg0: i32, %arg1: memref<1x3x256xf32, #tpu.memory_space<vmem>>, %arg2: memref<9x256xf32, #tpu.memory_space<vmem>>, %arg3: memref<9x16x8xf32, #tpu.memory_space<vmem>>, %arg4: memref<16x1xf32, #tpu.memory_space<vmem>>, %arg5: memref<9x3x16xf32, #tpu.memory_space<vmem>>, %arg6: memref<3x1xf32, #tpu.memory_space<vmem>>, %arg7: memref<1x3x256xf32, #tpu.memory_space<vmem>>) attributes {dimension_semantics = [#tpu.dimension_semantics<parallel>], iteration_bounds = array<i64: 2>, scalar_prefetch = 0 : i64, scratch_operands = 0 : i64, tpu.core_type = #tpu.core_type<tc>, window_params = [{transform_indices = @transform_0, window_bounds = array<i64: 1, 3, 256>}, {pipeline_mode = #tpu.pipeline_mode<synchronous>, transform_indices = @transform_1, window_bounds = array<i64: 9, 256>}, {pipeline_mode = #tpu.pipeline_mode<synchronous>, transform_indices = @transform_2, window_bounds = array<i64: 9, 16, 8>}, {pipeline_mode = #tpu.pipeline_mode<synchronous>, transform_indices = @transform_3, window_bounds = array<i64: 16, 1>}, {pipeline_mode = #tpu.pipeline_mode<synchronous>, transform_indices = @transform_4, window_bounds = array<i64: 9, 3, 16>}, {pipeline_mode = #tpu.pipeline_mode<synchronous>, transform_indices = @transform_5, window_bounds = array<i64: 3, 1>}, {transform_indices = @transform_6, window_bounds = array<i64: 1, 3, 256>}]} {
    %c0 = arith.constant 0 : index
    %c0_0 = arith.constant 0 : index
    %0 = vector.load %arg2[%c0, %c0_0] : memref<9x256xf32, #tpu.memory_space<vmem>>, vector<9x256xf32>
    %c0_1 = arith.constant 0 : index
    %c0_2 = arith.constant 0 : index
    %c0_3 = arith.constant 0 : index
    %1 = vector.load %arg3[%c0_1, %c0_2, %c0_3] : memref<9x16x8xf32, #tpu.memory_space<vmem>>, vector<9x16x8xf32>
    %c0_4 = arith.constant 0 : index
    %c0_5 = arith.constant 0 : index
    %c0_6 = arith.constant 0 : index
    %2 = vector.load %arg5[%c0_4, %c0_5, %c0_6] : memref<9x3x16xf32, #tpu.memory_space<vmem>>, vector<9x3x16xf32>
    %c0_7 = arith.constant 0 : index
    %c0_8 = arith.constant 0 : index
    %3 = vector.load %arg4[%c0_7, %c0_8] : memref<16x1xf32, #tpu.memory_space<vmem>>, vector<16x1xf32>
    %c0_9 = arith.constant 0 : index
    %c0_10 = arith.constant 0 : index
    %4 = vector.load %arg6[%c0_9, %c0_10] : memref<3x1xf32, #tpu.memory_space<vmem>>, vector<3x1xf32>
    %5 = vector.extract_strided_slice %0 {offsets = [0, 0], sizes = [1, 256], strides = [1, 1]} : vector<9x256xf32> to vector<1x256xf32>
    %6 = vector.extract_strided_slice %0 {offsets = [1, 0], sizes = [1, 256], strides = [1, 1]} : vector<9x256xf32> to vector<1x256xf32>
    %7 = vector.extract_strided_slice %0 {offsets = [2, 0], sizes = [1, 256], strides = [1, 1]} : vector<9x256xf32> to vector<1x256xf32>
    %8 = vector.extract_strided_slice %0 {offsets = [3, 0], sizes = [1, 256], strides = [1, 1]} : vector<9x256xf32> to vector<1x256xf32>
    %9 = vector.extract_strided_slice %0 {offsets = [4, 0], sizes = [1, 256], strides = [1, 1]} : vector<9x256xf32> to vector<1x256xf32>
    %10 = vector.extract_strided_slice %0 {offsets = [5, 0], sizes = [1, 256], strides = [1, 1]} : vector<9x256xf32> to vector<1x256xf32>
    %11 = vector.extract_strided_slice %0 {offsets = [6, 0], sizes = [1, 256], strides = [1, 1]} : vector<9x256xf32> to vector<1x256xf32>
    %12 = vector.extract_strided_slice %0 {offsets = [7, 0], sizes = [1, 256], strides = [1, 1]} : vector<9x256xf32> to vector<1x256xf32>
    %13 = vector.extract_strided_slice %0 {offsets = [8, 0], sizes = [1, 256], strides = [1, 1]} : vector<9x256xf32> to vector<1x256xf32>
    %cst = arith.constant 0.000000e+00 : f32
    %14 = vector.broadcast %cst : f32 to vector<5x256xf32>
    %c0_11 = arith.constant 0 : index
    %c0_12 = arith.constant 0 : index
    %c0_13 = arith.constant 0 : index
    %15 = vector.load %arg1[%c0_11, %c0_12, %c0_13] : memref<1x3x256xf32, #tpu.memory_space<vmem>>, vector<1x3x256xf32>
    %16 = vector.shape_cast %15 : vector<1x3x256xf32> to vector<3x256xf32>
    %17 = tpu.concatenate %16, %14 in 0 : vector<3x256xf32>, vector<5x256xf32> -> vector<8x256xf32>
    %c17_i32 = arith.constant 17 : i32
    %18 = tpu.dynamic_rotate %17 by %c17_i32 dim 1 : vector<8x256xf32>, i32 -> vector<8x256xf32>
    %19 = vector.broadcast %5 : vector<1x256xf32> to vector<8x256xf32>
    %20 = arith.mulf %18, %19 : vector<8x256xf32>
    %21 = vector.extract_strided_slice %1 {offsets = [0, 0, 0], sizes = [1, 16, 8], strides = [1, 1, 1]} : vector<9x16x8xf32> to vector<1x16x8xf32>
    %22 = vector.shape_cast %21 : vector<1x16x8xf32> to vector<16x8xf32>
    %cst_14 = arith.constant dense<0.000000e+00> : vector<16x256xf32>
    %23 = tpu.matmul %22, %20, %cst_14 {dimension_numbers = #tpu.dot_dimension_numbers<[1], [0], [0], [1], [0, 0, 1, 1], [], []>} : vector<16x8xf32>, vector<8x256xf32>, vector<16x256xf32> -> vector<16x256xf32>
    %c16_i32 = arith.constant 16 : i32
    %24 = tpu.dynamic_rotate %17 by %c16_i32 dim 1 : vector<8x256xf32>, i32 -> vector<8x256xf32>
    %25 = vector.broadcast %6 : vector<1x256xf32> to vector<8x256xf32>
    %26 = arith.mulf %24, %25 : vector<8x256xf32>
    %27 = vector.extract_strided_slice %1 {offsets = [1, 0, 0], sizes = [1, 16, 8], strides = [1, 1, 1]} : vector<9x16x8xf32> to vector<1x16x8xf32>
    %28 = vector.shape_cast %27 : vector<1x16x8xf32> to vector<16x8xf32>
    %cst_15 = arith.constant dense<0.000000e+00> : vector<16x256xf32>
    %29 = tpu.matmul %28, %26, %cst_15 {dimension_numbers = #tpu.dot_dimension_numbers<[1], [0], [0], [1], [0, 0, 1, 1], [], []>} : vector<16x8xf32>, vector<8x256xf32>, vector<16x256xf32> -> vector<16x256xf32>
    %30 = arith.addf %23, %29 : vector<16x256xf32>
    %c15_i32 = arith.constant 15 : i32
    %31 = tpu.dynamic_rotate %17 by %c15_i32 dim 1 : vector<8x256xf32>, i32 -> vector<8x256xf32>
    %32 = vector.broadcast %7 : vector<1x256xf32> to vector<8x256xf32>
    %33 = arith.mulf %31, %32 : vector<8x256xf32>
    %34 = vector.extract_strided_slice %1 {offsets = [2, 0, 0], sizes = [1, 16, 8], strides = [1, 1, 1]} : vector<9x16x8xf32> to vector<1x16x8xf32>
    %35 = vector.shape_cast %34 : vector<1x16x8xf32> to vector<16x8xf32>
    %cst_16 = arith.constant dense<0.000000e+00> : vector<16x256xf32>
    %36 = tpu.matmul %35, %33, %cst_16 {dimension_numbers = #tpu.dot_dimension_numbers<[1], [0], [0], [1], [0, 0, 1, 1], [], []>} : vector<16x8xf32>, vector<8x256xf32>, vector<16x256xf32> -> vector<16x256xf32>
    %37 = arith.addf %30, %36 : vector<16x256xf32>
    %c1_i32 = arith.constant 1 : i32
    %38 = tpu.dynamic_rotate %17 by %c1_i32 dim 1 : vector<8x256xf32>, i32 -> vector<8x256xf32>
    %39 = vector.broadcast %8 : vector<1x256xf32> to vector<8x256xf32>
    %40 = arith.mulf %38, %39 : vector<8x256xf32>
    %41 = vector.extract_strided_slice %1 {offsets = [3, 0, 0], sizes = [1, 16, 8], strides = [1, 1, 1]} : vector<9x16x8xf32> to vector<1x16x8xf32>
    %42 = vector.shape_cast %41 : vector<1x16x8xf32> to vector<16x8xf32>
    %cst_17 = arith.constant dense<0.000000e+00> : vector<16x256xf32>
    %43 = tpu.matmul %42, %40, %cst_17 {dimension_numbers = #tpu.dot_dimension_numbers<[1], [0], [0], [1], [0, 0, 1, 1], [], []>} : vector<16x8xf32>, vector<8x256xf32>, vector<16x256xf32> -> vector<16x256xf32>
    %44 = arith.addf %37, %43 : vector<16x256xf32>
    %45 = vector.broadcast %9 : vector<1x256xf32> to vector<8x256xf32>
    %46 = arith.mulf %17, %45 : vector<8x256xf32>
    %47 = vector.extract_strided_slice %1 {offsets = [4, 0, 0], sizes = [1, 16, 8], strides = [1, 1, 1]} : vector<9x16x8xf32> to vector<1x16x8xf32>
    %48 = vector.shape_cast %47 : vector<1x16x8xf32> to vector<16x8xf32>
    %cst_18 = arith.constant dense<0.000000e+00> : vector<16x256xf32>
    %49 = tpu.matmul %48, %46, %cst_18 {dimension_numbers = #tpu.dot_dimension_numbers<[1], [0], [0], [1], [0, 0, 1, 1], [], []>} : vector<16x8xf32>, vector<8x256xf32>, vector<16x256xf32> -> vector<16x256xf32>
    %50 = arith.addf %44, %49 : vector<16x256xf32>
    %c255_i32 = arith.constant 255 : i32
    %51 = tpu.dynamic_rotate %17 by %c255_i32 dim 1 : vector<8x256xf32>, i32 -> vector<8x256xf32>
    %52 = vector.broadcast %10 : vector<1x256xf32> to vector<8x256xf32>
    %53 = arith.mulf %51, %52 : vector<8x256xf32>
    %54 = vector.extract_strided_slice %1 {offsets = [5, 0, 0], sizes = [1, 16, 8], strides = [1, 1, 1]} : vector<9x16x8xf32> to vector<1x16x8xf32>
    %55 = vector.shape_cast %54 : vector<1x16x8xf32> to vector<16x8xf32>
    %cst_19 = arith.constant dense<0.000000e+00> : vector<16x256xf32>
    %56 = tpu.matmul %55, %53, %cst_19 {dimension_numbers = #tpu.dot_dimension_numbers<[1], [0], [0], [1], [0, 0, 1, 1], [], []>} : vector<16x8xf32>, vector<8x256xf32>, vector<16x256xf32> -> vector<16x256xf32>
    %57 = arith.addf %50, %56 : vector<16x256xf32>
    %c241_i32 = arith.constant 241 : i32
    %58 = tpu.dynamic_rotate %17 by %c241_i32 dim 1 : vector<8x256xf32>, i32 -> vector<8x256xf32>
    %59 = vector.broadcast %11 : vector<1x256xf32> to vector<8x256xf32>
    %60 = arith.mulf %58, %59 : vector<8x256xf32>
    %61 = vector.extract_strided_slice %1 {offsets = [6, 0, 0], sizes = [1, 16, 8], strides = [1, 1, 1]} : vector<9x16x8xf32> to vector<1x16x8xf32>
    %62 = vector.shape_cast %61 : vector<1x16x8xf32> to vector<16x8xf32>
    %cst_20 = arith.constant dense<0.000000e+00> : vector<16x256xf32>
    %63 = tpu.matmul %62, %60, %cst_20 {dimension_numbers = #tpu.dot_dimension_numbers<[1], [0], [0], [1], [0, 0, 1, 1], [], []>} : vector<16x8xf32>, vector<8x256xf32>, vector<16x256xf32> -> vector<16x256xf32>
    %64 = arith.addf %57, %63 : vector<16x256xf32>
    %c240_i32 = arith.constant 240 : i32
    %65 = tpu.dynamic_rotate %17 by %c240_i32 dim 1 : vector<8x256xf32>, i32 -> vector<8x256xf32>
    %66 = vector.broadcast %12 : vector<1x256xf32> to vector<8x256xf32>
    %67 = arith.mulf %65, %66 : vector<8x256xf32>
    %68 = vector.extract_strided_slice %1 {offsets = [7, 0, 0], sizes = [1, 16, 8], strides = [1, 1, 1]} : vector<9x16x8xf32> to vector<1x16x8xf32>
    %69 = vector.shape_cast %68 : vector<1x16x8xf32> to vector<16x8xf32>
    %cst_21 = arith.constant dense<0.000000e+00> : vector<16x256xf32>
    %70 = tpu.matmul %69, %67, %cst_21 {dimension_numbers = #tpu.dot_dimension_numbers<[1], [0], [0], [1], [0, 0, 1, 1], [], []>} : vector<16x8xf32>, vector<8x256xf32>, vector<16x256xf32> -> vector<16x256xf32>
    %71 = arith.addf %64, %70 : vector<16x256xf32>
    %c239_i32 = arith.constant 239 : i32
    %72 = tpu.dynamic_rotate %17 by %c239_i32 dim 1 : vector<8x256xf32>, i32 -> vector<8x256xf32>
    %73 = vector.broadcast %13 : vector<1x256xf32> to vector<8x256xf32>
    %74 = arith.mulf %72, %73 : vector<8x256xf32>
    %75 = vector.extract_strided_slice %1 {offsets = [8, 0, 0], sizes = [1, 16, 8], strides = [1, 1, 1]} : vector<9x16x8xf32> to vector<1x16x8xf32>
    %76 = vector.shape_cast %75 : vector<1x16x8xf32> to vector<16x8xf32>
    %cst_22 = arith.constant dense<0.000000e+00> : vector<16x256xf32>
    %77 = tpu.matmul %76, %74, %cst_22 {dimension_numbers = #tpu.dot_dimension_numbers<[1], [0], [0], [1], [0, 0, 1, 1], [], []>} : vector<16x8xf32>, vector<8x256xf32>, vector<16x256xf32> -> vector<16x256xf32>
    %78 = arith.addf %71, %77 : vector<16x256xf32>
    %79 = vector.broadcast %3 : vector<16x1xf32> to vector<16x256xf32>
    %80 = arith.addf %78, %79 : vector<16x256xf32>
    %cst_23 = arith.constant 0.000000e+00 : f32
    %81 = vector.broadcast %cst_23 : f32 to vector<16x256xf32>
    %82 = arith.maximumf %80, %81 : vector<16x256xf32>
    %83 = vector.extract_strided_slice %2 {offsets = [0, 0, 0], sizes = [1, 3, 16], strides = [1, 1, 1]} : vector<9x3x16xf32> to vector<1x3x16xf32>
    %84 = vector.shape_cast %83 : vector<1x3x16xf32> to vector<3x16xf32>
    %c17_i32_24 = arith.constant 17 : i32
    %85 = tpu.dynamic_rotate %82 by %c17_i32_24 dim 1 : vector<16x256xf32>, i32 -> vector<16x256xf32>
    %cst_25 = arith.constant dense<0.000000e+00> : vector<3x256xf32>
    %86 = tpu.matmul %84, %85, %cst_25 {dimension_numbers = #tpu.dot_dimension_numbers<[1], [0], [0], [1], [0, 0, 1, 1], [], []>} : vector<3x16xf32>, vector<16x256xf32>, vector<3x256xf32> -> vector<3x256xf32>
    %87 = vector.broadcast %5 : vector<1x256xf32> to vector<3x256xf32>
    %88 = arith.mulf %86, %87 : vector<3x256xf32>
    %89 = vector.extract_strided_slice %2 {offsets = [1, 0, 0], sizes = [1, 3, 16], strides = [1, 1, 1]} : vector<9x3x16xf32> to vector<1x3x16xf32>
    %90 = vector.shape_cast %89 : vector<1x3x16xf32> to vector<3x16xf32>
    %c16_i32_26 = arith.constant 16 : i32
    %91 = tpu.dynamic_rotate %82 by %c16_i32_26 dim 1 : vector<16x256xf32>, i32 -> vector<16x256xf32>
    %cst_27 = arith.constant dense<0.000000e+00> : vector<3x256xf32>
    %92 = tpu.matmul %90, %91, %cst_27 {dimension_numbers = #tpu.dot_dimension_numbers<[1], [0], [0], [1], [0, 0, 1, 1], [], []>} : vector<3x16xf32>, vector<16x256xf32>, vector<3x256xf32> -> vector<3x256xf32>
    %93 = vector.broadcast %6 : vector<1x256xf32> to vector<3x256xf32>
    %94 = arith.mulf %92, %93 : vector<3x256xf32>
    %95 = arith.addf %88, %94 : vector<3x256xf32>
    %96 = vector.extract_strided_slice %2 {offsets = [2, 0, 0], sizes = [1, 3, 16], strides = [1, 1, 1]} : vector<9x3x16xf32> to vector<1x3x16xf32>
    %97 = vector.shape_cast %96 : vector<1x3x16xf32> to vector<3x16xf32>
    %c15_i32_28 = arith.constant 15 : i32
    %98 = tpu.dynamic_rotate %82 by %c15_i32_28 dim 1 : vector<16x256xf32>, i32 -> vector<16x256xf32>
    %cst_29 = arith.constant dense<0.000000e+00> : vector<3x256xf32>
    %99 = tpu.matmul %97, %98, %cst_29 {dimension_numbers = #tpu.dot_dimension_numbers<[1], [0], [0], [1], [0, 0, 1, 1], [], []>} : vector<3x16xf32>, vector<16x256xf32>, vector<3x256xf32> -> vector<3x256xf32>
    %100 = vector.broadcast %7 : vector<1x256xf32> to vector<3x256xf32>
    %101 = arith.mulf %99, %100 : vector<3x256xf32>
    %102 = arith.addf %95, %101 : vector<3x256xf32>
    %103 = vector.extract_strided_slice %2 {offsets = [3, 0, 0], sizes = [1, 3, 16], strides = [1, 1, 1]} : vector<9x3x16xf32> to vector<1x3x16xf32>
    %104 = vector.shape_cast %103 : vector<1x3x16xf32> to vector<3x16xf32>
    %c1_i32_30 = arith.constant 1 : i32
    %105 = tpu.dynamic_rotate %82 by %c1_i32_30 dim 1 : vector<16x256xf32>, i32 -> vector<16x256xf32>
    %cst_31 = arith.constant dense<0.000000e+00> : vector<3x256xf32>
    %106 = tpu.matmul %104, %105, %cst_31 {dimension_numbers = #tpu.dot_dimension_numbers<[1], [0], [0], [1], [0, 0, 1, 1], [], []>} : vector<3x16xf32>, vector<16x256xf32>, vector<3x256xf32> -> vector<3x256xf32>
    %107 = vector.broadcast %8 : vector<1x256xf32> to vector<3x256xf32>
    %108 = arith.mulf %106, %107 : vector<3x256xf32>
    %109 = arith.addf %102, %108 : vector<3x256xf32>
    %110 = vector.extract_strided_slice %2 {offsets = [4, 0, 0], sizes = [1, 3, 16], strides = [1, 1, 1]} : vector<9x3x16xf32> to vector<1x3x16xf32>
    %111 = vector.shape_cast %110 : vector<1x3x16xf32> to vector<3x16xf32>
    %cst_32 = arith.constant dense<0.000000e+00> : vector<3x256xf32>
    %112 = tpu.matmul %111, %82, %cst_32 {dimension_numbers = #tpu.dot_dimension_numbers<[1], [0], [0], [1], [0, 0, 1, 1], [], []>} : vector<3x16xf32>, vector<16x256xf32>, vector<3x256xf32> -> vector<3x256xf32>
    %113 = vector.broadcast %9 : vector<1x256xf32> to vector<3x256xf32>
    %114 = arith.mulf %112, %113 : vector<3x256xf32>
    %115 = arith.addf %109, %114 : vector<3x256xf32>
    %116 = vector.extract_strided_slice %2 {offsets = [5, 0, 0], sizes = [1, 3, 16], strides = [1, 1, 1]} : vector<9x3x16xf32> to vector<1x3x16xf32>
    %117 = vector.shape_cast %116 : vector<1x3x16xf32> to vector<3x16xf32>
    %c255_i32_33 = arith.constant 255 : i32
    %118 = tpu.dynamic_rotate %82 by %c255_i32_33 dim 1 : vector<16x256xf32>, i32 -> vector<16x256xf32>
    %cst_34 = arith.constant dense<0.000000e+00> : vector<3x256xf32>
    %119 = tpu.matmul %117, %118, %cst_34 {dimension_numbers = #tpu.dot_dimension_numbers<[1], [0], [0], [1], [0, 0, 1, 1], [], []>} : vector<3x16xf32>, vector<16x256xf32>, vector<3x256xf32> -> vector<3x256xf32>
    %120 = vector.broadcast %10 : vector<1x256xf32> to vector<3x256xf32>
    %121 = arith.mulf %119, %120 : vector<3x256xf32>
    %122 = arith.addf %115, %121 : vector<3x256xf32>
    %123 = vector.extract_strided_slice %2 {offsets = [6, 0, 0], sizes = [1, 3, 16], strides = [1, 1, 1]} : vector<9x3x16xf32> to vector<1x3x16xf32>
    %124 = vector.shape_cast %123 : vector<1x3x16xf32> to vector<3x16xf32>
    %c241_i32_35 = arith.constant 241 : i32
    %125 = tpu.dynamic_rotate %82 by %c241_i32_35 dim 1 : vector<16x256xf32>, i32 -> vector<16x256xf32>
    %cst_36 = arith.constant dense<0.000000e+00> : vector<3x256xf32>
    %126 = tpu.matmul %124, %125, %cst_36 {dimension_numbers = #tpu.dot_dimension_numbers<[1], [0], [0], [1], [0, 0, 1, 1], [], []>} : vector<3x16xf32>, vector<16x256xf32>, vector<3x256xf32> -> vector<3x256xf32>
    %127 = vector.broadcast %11 : vector<1x256xf32> to vector<3x256xf32>
    %128 = arith.mulf %126, %127 : vector<3x256xf32>
    %129 = arith.addf %122, %128 : vector<3x256xf32>
    %130 = vector.extract_strided_slice %2 {offsets = [7, 0, 0], sizes = [1, 3, 16], strides = [1, 1, 1]} : vector<9x3x16xf32> to vector<1x3x16xf32>
    %131 = vector.shape_cast %130 : vector<1x3x16xf32> to vector<3x16xf32>
    %c240_i32_37 = arith.constant 240 : i32
    %132 = tpu.dynamic_rotate %82 by %c240_i32_37 dim 1 : vector<16x256xf32>, i32 -> vector<16x256xf32>
    %cst_38 = arith.constant dense<0.000000e+00> : vector<3x256xf32>
    %133 = tpu.matmul %131, %132, %cst_38 {dimension_numbers = #tpu.dot_dimension_numbers<[1], [0], [0], [1], [0, 0, 1, 1], [], []>} : vector<3x16xf32>, vector<16x256xf32>, vector<3x256xf32> -> vector<3x256xf32>
    %134 = vector.broadcast %12 : vector<1x256xf32> to vector<3x256xf32>
    %135 = arith.mulf %133, %134 : vector<3x256xf32>
    %136 = arith.addf %129, %135 : vector<3x256xf32>
    %137 = vector.extract_strided_slice %2 {offsets = [8, 0, 0], sizes = [1, 3, 16], strides = [1, 1, 1]} : vector<9x3x16xf32> to vector<1x3x16xf32>
    %138 = vector.shape_cast %137 : vector<1x3x16xf32> to vector<3x16xf32>
    %c239_i32_39 = arith.constant 239 : i32
    %139 = tpu.dynamic_rotate %82 by %c239_i32_39 dim 1 : vector<16x256xf32>, i32 -> vector<16x256xf32>
    %cst_40 = arith.constant dense<0.000000e+00> : vector<3x256xf32>
    %140 = tpu.matmul %138, %139, %cst_40 {dimension_numbers = #tpu.dot_dimension_numbers<[1], [0], [0], [1], [0, 0, 1, 1], [], []>} : vector<3x16xf32>, vector<16x256xf32>, vector<3x256xf32> -> vector<3x256xf32>
    %141 = vector.broadcast %13 : vector<1x256xf32> to vector<3x256xf32>
    %142 = arith.mulf %140, %141 : vector<3x256xf32>
    %143 = arith.addf %136, %142 : vector<3x256xf32>
    %144 = vector.broadcast %4 : vector<3x1xf32> to vector<3x256xf32>
    %145 = arith.addf %143, %144 : vector<3x256xf32>
    %c0_41 = arith.constant 0 : index
    %c0_42 = arith.constant 0 : index
    %c0_43 = arith.constant 0 : index
    %146 = vector.load %arg7[%c0_41, %c0_42, %c0_43] : memref<1x3x256xf32, #tpu.memory_space<vmem>>, vector<1x3x256xf32>
    %147 = vector.shape_cast %146 : vector<1x3x256xf32> to vector<3x256xf32>
    %148 = vector.shape_cast %145 : vector<3x256xf32> to vector<1x3x256xf32>
    tpu.vector_store %arg7[%c0_41, %c0_42, %c0_43], %148 {strides = array<i32>} : memref<1x3x256xf32, #tpu.memory_space<vmem>>, vector<1x3x256xf32>,
    return
  }
  func.func @transform_0(%arg0: i32) -> (i32, i32, i32) {
    %c0_i32 = arith.constant 0 : i32
    %c0_i32_0 = arith.constant 0 : i32
    %c0_i32_1 = arith.constant 0 : i32
    return %arg0, %c0_i32, %c0_i32_0 : i32, i32, i32
  }
  func.func @transform_1(%arg0: i32) -> (i32, i32) {
    %c0_i32 = arith.constant 0 : i32
    %c0_i32_0 = arith.constant 0 : i32
    %c0_i32_1 = arith.constant 0 : i32
    return %c0_i32, %c0_i32_0 : i32, i32
  }
  func.func @transform_2(%arg0: i32) -> (i32, i32, i32) {
    %c0_i32 = arith.constant 0 : i32
    %c0_i32_0 = arith.constant 0 : i32
    %c0_i32_1 = arith.constant 0 : i32
    %c0_i32_2 = arith.constant 0 : i32
    return %c0_i32, %c0_i32_0, %c0_i32_1 : i32, i32, i32
  }
  func.func @transform_3(%arg0: i32) -> (i32, i32) {
    %c0_i32 = arith.constant 0 : i32
    %c0_i32_0 = arith.constant 0 : i32
    %c0_i32_1 = arith.constant 0 : i32
    return %c0_i32, %c0_i32_0 : i32, i32
  }
  func.func @transform_4(%arg0: i32) -> (i32, i32, i32) {
    %c0_i32 = arith.constant 0 : i32
    %c0_i32_0 = arith.constant 0 : i32
    %c0_i32_1 = arith.constant 0 : i32
    %c0_i32_2 = arith.constant 0 : i32
    return %c0_i32, %c0_i32_0, %c0_i32_1 : i32, i32, i32
  }
  func.func @transform_5(%arg0: i32) -> (i32, i32) {
    %c0_i32 = arith.constant 0 : i32
    %c0_i32_0 = arith.constant 0 : i32
    %c0_i32_1 = arith.constant 0 : i32
    return %c0_i32, %c0_i32_0 : i32, i32
  }
  func.func @transform_6(%arg0: i32) -> (i32, i32, i32) {
    %c0_i32 = arith.constant 0 : i32
    %c0_i32_0 = arith.constant 0 : i32
    %c0_i32_1 = arith.constant 0 : i32
    return %arg0, %c0_i32, %c0_i32_0 : i32, i32, i32
  }
}

</mosaic_0001>

<bundles_post_ra>
// kernel: tpu_custom_call.1
= control target key start
LH: loop header
LB: loop body
LE: loop exit
PB: predicated region body
PF: predicated region fallthrough
CT: control target
= control target key end

     0   :  { %s2363_s21 = smov 0   ;;  %s2800_s0 = inlined_call_operand.vmem [shape: f32[2,3,256], index: 0, kind: input, shape index: {}]   ;;  %s2801_s1 = inlined_call_operand.vmem [shape: f32[9,256], index: 1, kind: input, shape index: {}]   ;;  %s2802_s2 = inlined_call_operand.vmem [shape: f32[9,16,8], index: 2, kind: input, shape index: {}]   ;;  %s2803_s3 = inlined_call_operand.vmem [shape: f32[16,1], index: 3, kind: input, shape index: {}]   ;;  %s2804_s4 = inlined_call_operand.vmem [shape: f32[9,3,16], index: 4, kind: input, shape index: {}]   ;;  %s2805_s5 = inlined_call_operand.vmem [shape: f32[3,1], index: 5, kind: input, shape index: {}]   ;;  %s2806_s6 = inlined_call_operand.vmem [shape: f32[2,3,256], index: 6, kind: output, shape index: {}]  }
   0x1 LB: > { %s2099_s22 = sadd.s32 4294967295, %s2316_s21   ;;  %p2103_p0 = scmp.ge.s32.totalorder %s2316_s21, 1  ;;  %s2316_s21 = sphi %s2363_s21, %s16_s21  }
   0x2   : > { %p212_p1 = scmp.lt.s32.totalorder %s2316_s21, 3 }
   0x4   : > { %p213_p2 = pnand %p2103_p0, %p212_p1 }
   0x5   : > { %p242_p3 = scmp.lt.s32.totalorder (!%p213_p2), %s2099_s22, 1  ;;  %v2318_v0 = vmov (!%p213_p2), 0.0   ;;  %vm290_vm0 = vcmask (!%p213_p2), 1042432   ;;  %s2319_s27 = smov (!%p213_p2), 15   ;;  %v283_v5 = vld [vmem:[%s2803_s3] sm:$0xff] (!%p213_p2)  ;;  %v284_v6 = vld [vmem:[%s2803_s3 + $0x8] sm:$0xff] (!%p213_p2)  ;;  %v297_v8 = vlaneseq (!%p213_p2) }
   0x6   : > { %216 = sbr.rel (%p213_p2) target bundleno = 794 (0x31a), region = 44  ;;  %583 = vmatprep.mubr.f32.mxu0 (!%p213_p2), %v2318_v0  ;;  %400 = vmatprep.mubr.f32.mxu1 (!%p213_p2), %v2318_v0  ;;  %s2320_s28 = smov (!%p213_p2), 1   ;;  %v2327_v7 = vmov (!%p213_p2), 0   ;;  %v2422_v13 = vld [vmem:[%s2801_s1] sm:$0xff] (!%p213_p2)  ;;  %v2427_v14 = vld [vmem:[%s2801_s1 + $0x8] sm:$0xff] (!%p213_p2)  ;;  %vm329_vm3 = vcmask (!%p213_p2), 64512  }
   0x7   : > { %s2321_s29 = smov (!%p213_p2), 127   ;;  %s2322_s30 = smov (!%p213_p2), 113   ;;  %2227 = vset.pattern.permute.xlu0 (!%p213_p2), %v2327_v7  ;;  %2228 = vset.pattern.permute.xlu1 (!%p213_p2), %v2327_v7  ;;  %v2413_v9 = vshrl.u32 (!%p213_p2), %v297_v8, 7  ;;  %v2415_v10 = vand.u32 (!%p213_p2), 127, %v297_v8  ;;  %v260_v33 = vld [vmem:[%s2802_s2 + $0x20] sm:$0xff] (!%p213_p2)  ;;  %v261_v39 = vld [vmem:[%s2802_s2 + $0x28] sm:$0xff] (!%p213_p2) }
   0x8   : > { %s2323_s7 = smov (!%p213_p2), 16   ;;  %s2324_s8 = smov (!%p213_p2), 112   ;;  %v262_v47 = vld [vmem:[%s2802_s2 + $0x30] sm:$0xff] (!%p213_p2)  ;;  %v263_v58 = vld [vmem:[%s2802_s2 + $0x38] sm:$0xff] (!%p213_p2)  ;;  %vm1247_vm10 = vcmask (!%p213_p2), 130048  }
   0x9   : > { %s2325_s9 = smov (!%p213_p2), 17   ;;  %s2326_s10 = smov (!%p213_p2), 111   ;;  %v609_v11 = vsub.s32 (!%p213_p2), 3, %v2413_v9  ;;  %v505_v12 = vsub.s32 (!%p213_p2), 2, %v2413_v9  ;;  %v706_v17 = vsub.s32 (!%p213_p2), 4, %v2413_v9  ;;  %vm500_vm1 = vcmp.lt.s32.totalorder (!%p213_p2), %v2415_v10, 15 }
   0xa   : > { %vm604_vm2 = vcmp.lt.s32.totalorder (!%p213_p2), %v2415_v10, 1  ;;  %v810_v36 = vsub.s32 (!%p213_p2), 5, %v2413_v9  ;;  %vm805_vm4 = vcmp.lt.s32.totalorder (!%p213_p2), %v2415_v10, 127  ;;  %v321_v38 = vsub.s32 (!%p213_p2), 1, %v2413_v9  ;;  %v258_v60 = vld [vmem:[%s2802_s2 + $0x10] sm:$0xff] (!%p213_p2)  ;;  %v259_v7 = vld [vmem:[%s2802_s2 + $0x18] sm:$0xff] (!%p213_p2) }
   0xb   : > { %v2433_v18 = vrot.slane (!%p213_p2), %v2427_v14, %v609_v11  ;;  %v2436_v19 = vrot.slane (!%p213_p2), %v2427_v14, %v505_v12  ;;  %v2439_v20 = vrot.slane (!%p213_p2), %v2422_v13, %v505_v12  ;;  %v2442_v21 = vrot.slane (!%p213_p2), %v2422_v13, %v609_v11 }
   0xc   : > { %v2445_v24 = vrot.slane (!%p213_p2), %v2427_v14, %v706_v17  ;;  %v2472_v40 = vrot.slane (!%p213_p2), %v2422_v13, %v706_v17  ;;  %v2475_v41 = vrot.slane (!%p213_p2), %v2427_v14, %v810_v36  ;;  %vm316_vm5 = vcmp.lt.s32.totalorder (!%p213_p2), %v2415_v10, 16 }
   0xd   : > { %s2808_s22 = smov (!%p242_p3, %s2099_s22), 1  ;;  %v2482_v45 = vrot.slane %v2427_v14, %v321_v38  ;;  %v2485_v46 = vrot.slane %v2422_v13, %v321_v38  ;;  %v914_v50 = vsub.s32 6, %v2413_v9  ;;  %vm909_vm6 = vcmp.lt.s32.totalorder %v2415_v10, 113  ;;  %v2596_v38 = vld [vmem:[%s2801_s1 + $0x18] ss:$0 sm:$0xff] }
   0xe   : > { %s2139_s23 = sshll.u32 %s2808_s22, 3  ;;  %v304_v57 = vsub.s32 0, %v2413_v9  ;;  %v2509_v59 = vrot.slane %v2422_v13, %v810_v36  ;;  %vm299_vm7 = vcmp.lt.s32.totalorder %v2415_v10, 17  ;;  %v1018_v11 = vsub.s32 7, %v2413_v9  ;;  %v265_v9 = vld [vmem:[%s2802_s2 + $0x48] sm:$0xff] }
   0xf   : > { %s246_s26 = scalar_lea.vmem %s2800_s0, %s2139_s23  ;;  %v2517_v62 = vrot.slane %v2427_v14, %v914_v50  ;;  %vm1013_vm8 = vcmp.lt.s32.totalorder %v2415_v10, 112  ;;  %vm1117_vm9 = vcmp.lt.s32.totalorder %v2415_v10, 111  ;;  %v282_v10 = vld [vmem:[%s2804_s4 + $0x20] sm:$0x7] }
  0x10   : > { %v286_v1 = vld [vmem:[%s246_s26] sm:$0x77]  ;;  %v2588_v36 = vrot.slane %v2422_v13, %v1018_v11 }
  0x11   : > { %v2381_v2 = vsel %vm290_vm0, %v286_v1, 0.0  ;;  %v288_v3 = vcombine.high %v286_v1, %v286_v1 }
  0x12   : > { %496 = vrot.lane.b32.xlu0 %v2381_v2, %s2319_s27  ;;  %600 = vrot.lane.b32.xlu1 %v2381_v2, %s2320_s28  ;;  %v712_v48 = vmul.f32 %v2472_v40, %v2381_v2 }
  0x13   : > { %v292_v4 = vsel %vm290_vm0, %v288_v3, 0.0  ;;  %v2525_v3 = vrot.slane %v2422_v13, %v304_v57 }
  0x14   : > { %v713_v34 = vmul.f32 %v2445_v24, %v292_v4 }
  0x16   : > { %498 = vrot.lane.b32.xlu0 %v292_v4, %s2319_s27  ;;  %602 = vrot.lane.b32.xlu1 %v292_v4, %s2320_s28 }
  0x1a   : > { %803 = vrot.lane.b32.xlu1 %v292_v4, %s2321_s29  ;;  %801 = vrot.lane.b32.xlu0 %v2381_v2, %s2321_s29 }
  0x1e   : > { %907 = vrot.lane.b32.xlu1 %v292_v4, %s2322_s30  ;;  %905 = vrot.lane.b32.xlu0 %v2381_v2, %s2322_s30 }
  0x22   : > { %314 = vrot.lane.b32.xlu1 %v292_v4, %s2323_s7  ;;  %312 = vrot.lane.b32.xlu0 %v2381_v2, %s2323_s7 }
  0x26   : > { %1011 = vrot.lane.b32.xlu1 %v292_v4, %s2324_s8  ;;  %1009 = vrot.lane.b32.xlu0 %v2381_v2, %s2324_s8 }
  0x2a   : > { %295 = vrot.lane.b32.xlu1 %v292_v4, %s2325_s9  ;;  %293 = vrot.lane.b32.xlu0 %v2381_v2, %s2325_s9 }
  0x2e   : > { %1115 = vrot.lane.b32.xlu1 %v292_v4, %s2326_s10  ;;  %1113 = vrot.lane.b32.xlu0 %v2381_v2, %s2326_s10  ;;  %v2528_v4 = vrot.slane %v2427_v14, %v304_v57 }
  0x32   : > { %1219 = vperm.xlu0 %2227, %v283_v5   ;;  %1224 = vperm.xlu1 %2228, %v284_v6   ;;  %v264_v6 = vld [vmem:[%s2802_s2 + $0x40] sm:$0xff] }
  0x84   : > { %v497_v15 = vpop.permute.xlu0 %496  ;;  %v601_v16 = vpop.permute.xlu1 %600 }
  0x88   : > { %v499_v22 = vpop.permute.xlu0 %498  ;;  %v603_v23 = vpop.permute.xlu1 %602 }
  0x89   : > { %v502_v25 = vsel %vm500_vm1, %v499_v22, %v497_v15  ;;  %v605_v26 = vsel %vm604_vm2, %v601_v16, %v603_v23  ;;  %v606_v27 = vsel %vm604_vm2, %v603_v23, %v601_v16  ;;  %v501_v28 = vsel %vm500_vm1, %v497_v15, %v499_v22 }
  0x8a   : > { %v616_v29 = vmul.f32 %v2433_v18, %v605_v26  ;;  %v512_v30 = vmul.f32 %v2436_v19, %v501_v28  ;;  %v511_v31 = vmul.f32 %v2439_v20, %v502_v25  ;;  %v615_v32 = vmul.f32 %v2442_v21, %v606_v27  ;;  %v256_v26 = vld [vmem:[%s2802_s2] sm:$0xff] }
  0x8b   : > { %v2555_v25 = vrot.slane %v2422_v13, %v914_v50  ;;  %v2563_v28 = vrot.slane %v2427_v14, %v1018_v11  ;;  %v266_v14 = vld [vmem:[%s2802_s2 + $0x50] sm:$0xff]  ;;  %v268_v13 = vld [vmem:[%s2802_s2 + $0x60] sm:$0xff] }
  0x8c   : > { %519 = vmatprep.subr.mxu0 %v512_v30  ;;  %v804_v35 = vpop.permute.xlu1 %803  ;;  %v802_v37 = vpop.permute.xlu0 %801  ;;  %v270_v50 = vld [vmem:[%s2802_s2 + $0x70] sm:$0xff] }
  0x8d   : > { %520 = vmatpush1.msra.mxu0 %v511_v31  ;;  %v807_v44 = vsel %vm805_vm4, %v804_v35, %v802_v37  ;;  %v806_v61 = vsel %vm805_vm4, %v802_v37, %v804_v35  ;;  %v257_v31 = vld [vmem:[%s2802_s2 + $0x8] sm:$0xff]  ;;  %v267_v35 = vld [vmem:[%s2802_s2 + $0x58] sm:$0xff] }
  0x8e   : > { %2112 = vmatmul.mubr.msk.f32.vlgmr.msra.gmra.mrb[0].mxu0 %vm329_vm3, %v260_v33  ;;  %623 = vmatprep.subr.mxu0 %v616_v29  ;;  %v817_v49 = vmul.f32 %v2475_v41, %v807_v44  ;;  %v816_v5 = vmul.f32 %v2509_v59, %v806_v61  ;;  %v269_v44 = vld [vmem:[%s2802_s2 + $0x68] sm:$0xff] }
  0x8f   : > { %624 = vmatpush1.msra.mxu0 %v615_v32  ;;  %589 = vmatprep.mubr.f32.mxu0 %v2318_v0 }
  0x90   : > { %720 = vmatprep.subr.mxu0 %v713_v34  ;;  %v908_v42 = vpop.permute.xlu1 %907  ;;  %v906_v43 = vpop.permute.xlu0 %905 }
  0x91   : > { %v911_v2 = vsel %vm909_vm6, %v908_v42, %v906_v43  ;;  %v910_v27 = vsel %vm909_vm6, %v906_v43, %v908_v42 }
  0x92   : > { %2113 = vmatmul.mubr.msk.f32.gmra.mrb[2].mxu0 %vm329_vm3, %v261_v39  ;;  %v921_v8 = vmul.f32 %v2517_v62, %v911_v2  ;;  %v920_v30 = vmul.f32 %v2555_v25, %v910_v27 }
  0x93   : > { %687 = vmatprep.mubr.f32.mxu0 %v2318_v0 }
  0x94   : > { %v315_v51 = vpop.permute.xlu1 %314  ;;  %v313_v52 = vpop.permute.xlu0 %312 }
  0x95   : > { %v318_v53 = vsel %vm316_vm5, %v315_v51, %v313_v52  ;;  %v317_v54 = vsel %vm316_vm5, %v313_v52, %v315_v51  ;;  %v271_v51 = vld [vmem:[%s2802_s2 + $0x78] sm:$0xff]  ;;  %v272_v52 = vld [vmem:[%s2802_s2 + $0x80] sm:$0xff] }
  0x96   : > { %2114 = vmatmul.mubr.msk.f32.vlgmr.msra.gmra.mrb[0].mxu0 %vm329_vm3, %v262_v47  ;;  %v328_v55 = vmul.f32 %v2482_v45, %v317_v54  ;;  %v327_v56 = vmul.f32 %v2485_v46, %v318_v53  ;;  %v2615_v47 = vld [vmem:[%s2801_s1 + $0x10] ss:$0 sm:$0xff]  ;;  %v273_v53 = vld [vmem:[%s2802_s2 + $0x88] sm:$0xff] }
  0x97   : > { %693 = vmatprep.mubr.f32.mxu0 %v2318_v0  ;;  %721 = vmatpush1.msra.mxu0 %v712_v48 }
  0x98   : > { %824 = vmatprep.subr.mxu0 %v817_v49  ;;  %v1012_v63 = vpop.permute.xlu1 %1011  ;;  %336 = vmatprep.subr.mxu1 %v328_v55  ;;  %v1010_v1 = vpop.permute.xlu0 %1009 }
  0x99   : > { %337 = vmatpush1.msra.mxu1 %v327_v56  ;;  %v1015_v29 = vsel %vm1013_vm8, %v1012_v63, %v1010_v1  ;;  %v1014_v37 = vsel %vm1013_vm8, %v1010_v1, %v1012_v63 }
  0x9a   : > { %2115 = vmatmul.mubr.msk.f32.gmra.mrb[2].mxu0 %vm329_vm3, %v263_v58  ;;  %2108 = vmatmul.mubr.msk.f32.vlgmr.msra.gmra.mrb[0].mxu1 %vm329_vm3, %v258_v60  ;;  %v1025_v32 = vmul.f32 %v2563_v28, %v1015_v29  ;;  %v1024_v42 = vmul.f32 %v2588_v36, %v1014_v37 }
  0x9b   : > { %784 = vmatprep.mubr.f32.mxu0 %v2318_v0  ;;  %406 = vmatprep.mubr.f32.mxu1 %v2318_v0 }
  0x9c   : > { %v296_v12 = vpop.permute.xlu1 %295  ;;  %v294_v15 = vpop.permute.xlu0 %293 }
  0x9d   : > { %v300_v16 = vsel %vm299_vm7, %v294_v15, %v296_v12  ;;  %v301_v17 = vsel %vm299_vm7, %v296_v12, %v294_v15 }
  0x9e   : > { %2116 = vmatmul.mubr.msk.f32.vlgmr.msra.gmra.mrb[0].mxu0 %vm329_vm3, %v264_v6  ;;  %v310_v22 = vmul.f32 %v2525_v3, %v301_v17  ;;  %v311_v23 = vmul.f32 %v2528_v4, %v300_v16  ;;  %2109 = vmatmul.mubr.msk.f32.gmra.mrb[2].mxu1 %vm329_vm3, %v259_v7 }
  0x9f   : > { %790 = vmatprep.mubr.f32.mxu0 %v2318_v0  ;;  %825 = vmatpush1.msra.mxu0 %v816_v5 }
  0xa0   : > { %928 = vmatprep.subr.mxu0 %v921_v8  ;;  %419 = vmatprep.subr.mxu1 %v311_v23  ;;  %v1116_v33 = vpop.permute.xlu1 %1115  ;;  %v1114_v34 = vpop.permute.xlu0 %1113 }
  0xa1   : > { %420 = vmatpush1.msra.mxu1 %v310_v22  ;;  %483 = vmatprep.mubr.f32.mxu1 %v2318_v0  ;;  %v1119_v39 = vsel %vm1117_vm9, %v1116_v33, %v1114_v34  ;;  %v1118_v48 = vsel %vm1117_vm9, %v1114_v34, %v1116_v33 }
  0xa2   : > { %2117 = vmatmul.mubr.msk.f32.gmra.mrb[2].mxu0 %vm329_vm3, %v265_v9  ;;  %2110 = vmatmul.mubr.msk.f32.vlgmr.msra.gmra.mrb[0].mxu1 %vm329_vm3, %v256_v26  ;;  %v1129_v43 = vmul.f32 %v2596_v38, %v1119_v39  ;;  %v1128_v49 = vmul.f32 %v2615_v47, %v1118_v48 }
  0xa3   : > { %888 = vmatprep.mubr.f32.mxu0 %v2318_v0  ;;  %489 = vmatprep.mubr.f32.mxu1 %v2318_v0 }
  0xa6   : > { %2118 = vmatmul.mubr.msk.f32.vlgmr.msra.gmra.mrb[0].mxu0 %vm329_vm3, %v266_v14  ;;  %2111 = vmatmul.mubr.msk.f32.gmra.mrb[2].mxu1 %vm329_vm3, %v257_v31  ;;  %v285_v14 = vld [vmem:[%s2805_s5] sm:$0x7] }
  0xa7   : > { %894 = vmatprep.mubr.f32.mxu0 %v2318_v0  ;;  %929 = vmatpush1.msra.mxu0 %v920_v30 }
  0xa8   : > { %1032 = vmatprep.subr.mxu0 %v1025_v32  ;;  %1315 = vmatprep.mubr.f32.mxu1 %v2318_v0 }
  0xaa   : > { %2119 = vmatmul.mubr.msk.f32.gmra.mrb[2].mxu0 %vm329_vm3, %v267_v35 }
  0xab   : > { %992 = vmatprep.mubr.f32.mxu0 %v2318_v0 }
  0xae   : > { %2120 = vmatmul.mubr.msk.f32.vlgmr.msra.gmra.mrb[0].mxu0 %vm329_vm3, %v268_v13 }
  0xaf   : > { %998 = vmatprep.mubr.f32.mxu0 %v2318_v0  ;;  %1033 = vmatpush1.msra.mxu0 %v1024_v42 }
  0xb0   : > { %1136 = vmatprep.subr.mxu0 %v1129_v43 }
  0xb1   : > { %v1220_v1 = vpop.permute.xlu0 %1219  ;;  %v1225_v5 = vpop.permute.xlu1 %1224 }
  0xb2   : > { %2121 = vmatmul.mubr.msk.f32.gmra.mrb[2].mxu0 %vm329_vm3, %v269_v44 }
  0xb3   : > { %1096 = vmatprep.mubr.f32.mxu0 %v2318_v0 }
  0xb6   : > { %2122 = vmatmul.mubr.msk.f32.vlgmr.msra.gmra.mrb[0].mxu0 %vm329_vm3, %v270_v50 }
  0xb7   : > { %1102 = vmatprep.mubr.f32.mxu0 %v2318_v0  ;;  %1137 = vmatpush1.msra.mxu0 %v1128_v49 }
  0xba   : > { %2123 = vmatmul.mubr.msk.f32.gmra.mrb[2].mxu0 %vm329_vm3, %v271_v51 }
  0xbb   : > { %1200 = vmatprep.mubr.f32.mxu0 %v2318_v0 }
  0xbe   : > { %2126 = vmatmul.mubr.msk.f32.vlgmr.msra.gmra.mrb[0].mxu0 %vm329_vm3, %v272_v52 }
  0xbf   : > { %1206 = vmatprep.mubr.f32.mxu0 %v2318_v0 }
  0xc2   : > { %2127 = vmatmul.mubr.msk.f32.gmra.mrb[2].mxu0 %vm329_vm3, %v273_v53 }
 0x175   : > { %v485_v54 = vpop.f32.mrb[0].mxu1 }
 0x176   : > { %v487_v55 = vpop.f32.mrb[1].mxu1 }
 0x179   : > { %v491_v56 = vpop.f32.mrb[2].mxu1 }
 0x17a   : > { %v493_v57 = vpop.f32.mrb[3].mxu1 }
 0x191   : > { %v1202_v58 = vpop.f32.mrb[0].mxu0 }
 0x192   : > { %v2177_v60 = vadd.f32 %v1202_v58, %v485_v54  ;;  %v1204_v61 = vpop.f32.mrb[1].mxu0  ;;  %v274_v58 = vld [vmem:[%s2804_s4] sm:$0x7] }
 0x193   : > { %v2178_v63 = vadd.f32 %v1204_v61, %v487_v55 }
 0x194   : > { %v1227_v6 = vadd.f32 %v2177_v60, %v1220_v1 }
 0x195   : > { %v1208_v2 = vpop.f32.mrb[2].mxu0  ;;  %v1228_v11 = vadd.f32 %v2178_v63, %v1220_v1 }
 0x196   : > { %v2179_v7 = vadd.f32 %v1208_v2, %v491_v56  ;;  %v1210_v8 = vpop.f32.mrb[3].mxu0  ;;  %v1231_v17 = vmax.f32 %v1227_v6, 0.0 }
 0x197   : > { %v2180_v12 = vadd.f32 %v1210_v8, %v493_v57  ;;  %v1232_v23 = vmax.f32 %v1228_v11, 0.0 }
 0x198   : > { %v1229_v15 = vadd.f32 %v2179_v7, %v1225_v5 }
 0x199   : > { %v1230_v16 = vadd.f32 %v2180_v12, %v1225_v5 }
 0x19a   : > { %v1233_v22 = vmax.f32 %v1229_v15, 0.0 }
 0x19b   : > { %v1234_v9 = vmax.f32 %v1230_v16, 0.0  ;;  %v275_v16 = vld [vmem:[%s2804_s4 + $0x4] sm:$0x7] }
 0x19c   : > { %v2229_v26 = vpack.i.bf16 %v1233_v22, %v1231_v17  ;;  %v2645_v30 = vpack.c.bf16 %v1233_v22, %v1231_v17 }
 0x19d   : > { %v2249_v27 = vpack.i.bf16 %v1234_v9, %v1232_v23  ;;  %v2643_v29 = vpack.c.bf16 %v1234_v9, %v1232_v23 }
 0x19e   : > { %2230 = vrot.lane.b32.xlu1 %v2229_v26, %s2325_s9 }
 0x19f   : > { %2250 = vrot.lane.b32.xlu0 %v2249_v27, %s2325_s9 }
 0x1a2   : > { %2235 = vrot.lane.b32.xlu1 %v2229_v26, %s2323_s7 }
 0x1a3   : > { %2255 = vrot.lane.b32.xlu0 %v2249_v27, %s2323_s7  ;;  %s251_s7 = scalar_lea.vmem %s2806_s6, %s2139_s23 }
 0x1a6   : > { %2240 = vrot.lane.b32.xlu1 %v2229_v26, %s2319_s27 }
 0x1a7   : > { %2260 = vrot.lane.b32.xlu0 %v2249_v27, %s2319_s27 }
 0x1aa   : > { %2245 = vrot.lane.b32.xlu1 %v2229_v26, %s2320_s28 }
 0x1ab   : > { %2265 = vrot.lane.b32.xlu0 %v2249_v27, %s2320_s28 }
 0x1ae   : > { %2270 = vrot.lane.b32.xlu1 %v2229_v26, %s2321_s29 }
 0x1af   : > { %2290 = vrot.lane.b32.xlu0 %v2249_v27, %s2321_s29 }
 0x1b2   : > { %2275 = vrot.lane.b32.xlu1 %v2229_v26, %s2322_s30 }
 0x1b3   : > { %2295 = vrot.lane.b32.xlu0 %v2249_v27, %s2322_s30 }
 0x1b6   : > { %2280 = vrot.lane.b32.xlu1 %v2229_v26, %s2324_s8 }
 0x1b7   : > { %2300 = vrot.lane.b32.xlu0 %v2249_v27, %s2324_s8 }
 0x1ba   : > { %2285 = vrot.lane.b32.xlu1 %v2229_v26, %s2326_s10 }
 0x1bb   : > { %2305 = vrot.lane.b32.xlu0 %v2249_v27, %s2326_s10 }
 0x1be   : > { %2034 = vperm.xlu1 %2228, %v285_v14  }
 0x210   : > { %v2231_v31 = vpop.permute.xlu1 %2230 }
 0x211   : > { %v2233_v32 = vunpack.i.h.bf16 %v2231_v31  ;;  %v2232_v33 = vunpack.i.l.bf16 %v2231_v31  ;;  %v2251_v34 = vpop.permute.xlu0 %2250 }
 0x212   : > { %v2253_v35 = vunpack.i.h.bf16 %v2251_v34  ;;  %v2252_v37 = vunpack.i.l.bf16 %v2251_v34 }
 0x214   : > { %v1246_v39 = vsel %vm299_vm7, %v2253_v35, %v2233_v32  ;;  %v1245_v42 = vsel %vm299_vm7, %v2252_v37, %v2232_v33  ;;  %v2236_v13 = vpop.permute.xlu1 %2235  ;;  %v1243_v43 = vsel %vm299_vm7, %v2232_v33, %v2252_v37  ;;  %v1244_v44 = vsel %vm299_vm7, %v2233_v32, %v2253_v35 }
 0x215   : > { %v2143_v48 = vpack.c.bf16 %v1246_v39, %v1245_v42  ;;  %v2238_v49 = vunpack.i.h.bf16 %v2236_v13  ;;  %v2237_v50 = vunpack.i.l.bf16 %v2236_v13  ;;  %v2256_v51 = vpop.permute.xlu0 %2255  ;;  %v2141_v52 = vpack.c.bf16 %v1244_v44, %v1243_v43  ;;  %v276_v44 = vld [vmem:[%s2804_s4 + $0x8] sm:$0x7] }
 0x216   : > { %v2258_v53 = vunpack.i.h.bf16 %v2256_v51  ;;  %v2257_v54 = vunpack.i.l.bf16 %v2256_v51 }
 0x217   : > { %2142 = vmatprep.subr.bf16.mxu1 %v2141_v52 }
 0x218   : > { %v1335_v55 = vsel %vm316_vm5, %v2258_v53, %v2238_v49  ;;  %v1334_v56 = vsel %vm316_vm5, %v2257_v54, %v2237_v50  ;;  %v2241_v57 = vpop.permute.xlu1 %2240  ;;  %2144 = vmatpush1.bf16.msra.mxu1 %v2143_v48  ;;  %v1332_v60 = vsel %vm316_vm5, %v2237_v50, %v2257_v54  ;;  %v1333_v61 = vsel %vm316_vm5, %v2238_v49, %v2258_v53 }
 0x219   : > { %v2147_v63 = vpack.c.bf16 %v1335_v55, %v1334_v56  ;;  %v2243_v1 = vunpack.i.h.bf16 %v2241_v57  ;;  %v2242_v2 = vunpack.i.l.bf16 %v2241_v57  ;;  %v2261_v5 = vpop.permute.xlu0 %2260  ;;  %v2145_v6 = vpack.c.bf16 %v1333_v61, %v1332_v60  ;;  %v277_v56 = vld [vmem:[%s2804_s4 + $0xc] sm:$0x7] }
 0x21a   : > { %v2263_v7 = vunpack.i.h.bf16 %v2261_v5  ;;  %v2262_v8 = vunpack.i.l.bf16 %v2261_v5 }
 0x21b   : > { %2128 = vmatmul.mubr.msk.f32.vlgmr.msra.gmra.mrb[4].mxu1 %vm1247_vm10, %v274_v58  ;;  %2146 = vmatprep.subr.bf16.mxu1 %v2145_v6 }
 0x21c   : > { %v1425_v11 = vsel %vm500_vm1, %v2263_v7, %v2243_v1  ;;  %v1424_v12 = vsel %vm500_vm1, %v2262_v8, %v2242_v2  ;;  %v2246_v15 = vpop.permute.xlu1 %2245  ;;  %2148 = vmatpush1.bf16.msra.mxu1 %v2147_v63  ;;  %1403 = vmatprep.mubr.f32.mxu1 %v2318_v0  ;;  %v1422_v17 = vsel %vm500_vm1, %v2242_v2, %v2262_v8 }
 0x21d   : > { %v2151_v22 = vpack.c.bf16 %v1425_v11, %v1424_v12  ;;  %v2248_v23 = vunpack.i.h.bf16 %v2246_v15  ;;  %v2247_v9 = vunpack.i.l.bf16 %v2246_v15  ;;  %v2266_v26 = vpop.permute.xlu0 %2265  ;;  %v1423_v27 = vsel %vm500_vm1, %v2243_v1, %v2263_v7 }
 0x21e   : > { %v2268_v14 = vunpack.i.h.bf16 %v2266_v26  ;;  %v2267_v31 = vunpack.i.l.bf16 %v2266_v26  ;;  %v2149_v32 = vpack.c.bf16 %v1423_v27, %v1422_v17 }
 0x21f   : > { %2129 = vmatmul.mubr.msk.f32.vlgmr.msra.gmra.mrb[6].mxu1 %vm1247_vm10, %v275_v16 }
 0x220   : > { %v1515_v33 = vsel %vm604_vm2, %v2268_v14, %v2248_v23  ;;  %v1514_v34 = vsel %vm604_vm2, %v2267_v31, %v2247_v9  ;;  %2150 = vmatprep.subr.bf16.mxu1 %v2149_v32  ;;  %v2271_v35 = vpop.permute.xlu1 %2270  ;;  %1493 = vmatprep.mubr.f32.mxu1 %v2318_v0  ;;  %v1512_v37 = vsel %vm604_vm2, %v2247_v9, %v2267_v31  ;;  %v279_v31 = vld [vmem:[%s2804_s4 + $0x14] sm:$0x7] }
 0x221   : > { %v2155_v39 = vpack.c.bf16 %v1515_v33, %v1514_v34  ;;  %v2273_v42 = vunpack.i.h.bf16 %v2271_v35  ;;  %v2272_v13 = vunpack.i.l.bf16 %v2271_v35  ;;  %2152 = vmatpush1.bf16.msra.mxu1 %v2151_v22  ;;  %v2291_v43 = vpop.permute.xlu0 %2290  ;;  %v1513_v48 = vsel %vm604_vm2, %v2248_v23, %v2268_v14 }
 0x222   : > { %v2293_v49 = vunpack.i.h.bf16 %v2291_v43  ;;  %v2292_v50 = vunpack.i.l.bf16 %v2291_v43  ;;  %v2153_v51 = vpack.c.bf16 %v1513_v48, %v1512_v37  ;;  %v280_v43 = vld [vmem:[%s2804_s4 + $0x18] sm:$0x7] }
 0x224   : > { %2130 = vmatmul.mubr.msk.f32.vlgmr.msra.gmra.mrb[8].mxu1 %vm1247_vm10, %v276_v44  ;;  %2154 = vmatprep.subr.bf16.mxu1 %v2153_v51  ;;  %v2276_v52 = vpop.permute.xlu1 %2275  ;;  %v1682_v57 = vsel %vm805_vm4, %v2292_v50, %v2272_v13  ;;  %v1683_v58 = vsel %vm805_vm4, %v2293_v49, %v2273_v42  ;;  %v1681_v63 = vsel %vm805_vm4, %v2273_v42, %v2293_v49 }
 0x225   : > { %v2278_v53 = vunpack.i.h.bf16 %v2276_v52  ;;  %v2277_v54 = vunpack.i.l.bf16 %v2276_v52  ;;  %2156 = vmatpush1.bf16.msra.mxu1 %v2155_v39  ;;  %v2296_v55 = vpop.permute.xlu0 %2295  ;;  %1583 = vmatprep.mubr.f32.mxu1 %v2318_v0  ;;  %v1680_v1 = vsel %vm805_vm4, %v2272_v13, %v2292_v50  ;;  %v2161_v5 = vpack.c.bf16 %v1683_v58, %v1682_v57 }
 0x226   : > { %v2298_v60 = vunpack.i.h.bf16 %v2296_v55  ;;  %v2297_v61 = vunpack.i.l.bf16 %v2296_v55  ;;  %2158 = vmatprep.subr.bf16.mxu1 %v2643_v29  ;;  %v278_v29 = vld [vmem:[%s2804_s4 + $0x10] sm:$0x7]  ;;  %v2163_v17 = vpack.c.bf16 %v1681_v63, %v1680_v1 }
 0x228   : > { %2131 = vmatmul.mubr.msk.f32.vlgmr.msra.gmra.mrb[10].mxu1 %vm1247_vm10, %v277_v56  ;;  %v2281_v2 = vpop.permute.xlu1 %2280  ;;  %v1772_v11 = vsel %vm909_vm6, %v2297_v61, %v2277_v54  ;;  %v1773_v12 = vsel %vm909_vm6, %v2298_v60, %v2278_v53  ;;  %v1770_v22 = vsel %vm909_vm6, %v2277_v54, %v2297_v61 }
 0x229   : > { %v2283_v6 = vunpack.i.h.bf16 %v2281_v2  ;;  %v2282_v7 = vunpack.i.l.bf16 %v2281_v2  ;;  %2160 = vmatpush1.bf16.msra.mxu1 %v2645_v30  ;;  %v2301_v8 = vpop.permute.xlu0 %2300  ;;  %1661 = vmatprep.mubr.f32.mxu1 %v2318_v0  ;;  %v1771_v30 = vsel %vm909_vm6, %v2278_v53, %v2298_v60  ;;  %v2165_v9 = vpack.c.bf16 %v1773_v12, %v1772_v11  ;;  %v281_v53 = vld [vmem:[%s2804_s4 + $0x1c] sm:$0x7] }
 0x22a   : > { %v2303_v15 = vunpack.i.h.bf16 %v2301_v8  ;;  %v2302_v16 = vunpack.i.l.bf16 %v2301_v8  ;;  %2162 = vmatprep.subr.bf16.mxu1 %v2161_v5  ;;  %v2167_v37 = vpack.c.bf16 %v1771_v30, %v1770_v22 }
 0x22c   : > { %2132 = vmatmul.mubr.msk.f32.vlgmr.msra.gmra.mrb[12].mxu1 %vm1247_vm10, %v278_v29  ;;  %v2286_v23 = vpop.permute.xlu1 %2285  ;;  %v1862_v32 = vsel %vm1013_vm8, %v2302_v16, %v2282_v7  ;;  %v1863_v33 = vsel %vm1013_vm8, %v2303_v15, %v2283_v6  ;;  %v1861_v39 = vsel %vm1013_vm8, %v2283_v6, %v2303_v15  ;;  %v1860_v42 = vsel %vm1013_vm8, %v2282_v7, %v2302_v16 }
 0x22d   : > { %v2288_v26 = vunpack.i.h.bf16 %v2286_v23  ;;  %v2287_v27 = vunpack.i.l.bf16 %v2286_v23  ;;  %2164 = vmatpush1.bf16.msra.mxu1 %v2163_v17  ;;  %v2306_v14 = vpop.permute.xlu0 %2305  ;;  %1751 = vmatprep.mubr.f32.mxu1 %v2318_v0  ;;  %v2169_v13 = vpack.c.bf16 %v1863_v33, %v1862_v32  ;;  %v2171_v49 = vpack.c.bf16 %v1861_v39, %v1860_v42 }
 0x22e   : > { %v2308_v34 = vunpack.i.h.bf16 %v2306_v14  ;;  %v2307_v35 = vunpack.i.l.bf16 %v2306_v14  ;;  %2166 = vmatprep.subr.bf16.mxu1 %v2165_v9 }
 0x230   : > { %2133 = vmatmul.mubr.msk.f32.vlgmr.msra.gmra.mrb[14].mxu1 %vm1247_vm10, %v279_v31  ;;  %v1952_v44 = vsel %vm1117_vm9, %v2307_v35, %v2287_v27  ;;  %v1953_v48 = vsel %vm1117_vm9, %v2308_v34, %v2288_v26  ;;  %v1951_v50 = vsel %vm1117_vm9, %v2288_v26, %v2308_v34  ;;  %v1950_v51 = vsel %vm1117_vm9, %v2287_v27, %v2307_v35 }
 0x231   : > { %2168 = vmatpush1.bf16.msra.mxu1 %v2167_v37  ;;  %1841 = vmatprep.mubr.f32.mxu1 %v2318_v0  ;;  %v2173_v52 = vpack.c.bf16 %v1953_v48, %v1952_v44  ;;  %v2175_v54 = vpack.c.bf16 %v1951_v50, %v1950_v51 }
 0x232   : > { %2170 = vmatprep.subr.bf16.mxu1 %v2169_v13 }
 0x234   : > { %2134 = vmatmul.mubr.msk.f32.vlgmr.msra.gmra.mrb[16].mxu1 %vm1247_vm10, %v280_v43 }
 0x235   : > { %2172 = vmatpush1.bf16.msra.mxu1 %v2171_v49  ;;  %1931 = vmatprep.mubr.f32.mxu1 %v2318_v0 }
 0x236   : > { %2174 = vmatprep.subr.bf16.mxu1 %v2173_v52 }
 0x238   : > { %2135 = vmatmul.mubr.msk.f32.vlgmr.msra.gmra.mrb[18].mxu1 %vm1247_vm10, %v281_v53 }
 0x239   : > { %2176 = vmatpush1.bf16.msra.mxu1 %v2175_v54  ;;  %2021 = vmatprep.mubr.f32.mxu1 %v2318_v0 }
 0x23c   : > { %2136 = vmatmul.mubr.msk.f32.vlgmr.msra.gmra.mrb[20].mxu1 %vm1247_vm10, %v282_v10 }
 0x23d   : > { %v2035_v48 = vpop.permute.xlu1 %2034 }
 0x2ee   : > { %v1317_v55 = vpop.f32.mrb[4].mxu1 }
 0x2ef   : > { %v1319_v56 = vpop.f32.mrb[5].mxu1  ;;  %v1322_v58 = vmul.f32 %v1317_v55, %v2525_v3 }
 0x2f0   : > { %v1323_v63 = vmul.f32 %v1319_v56, %v2528_v4 }
 0x2f2   : > { %v1405_v57 = vpop.f32.mrb[6].mxu1 }
 0x2f3   : > { %v1410_v60 = vmul.f32 %v1405_v57, %v2485_v46  ;;  %v1407_v61 = vpop.f32.mrb[7].mxu1 }
 0x2f4   : > { %v1411_v1 = vmul.f32 %v1407_v61, %v2482_v45 }
 0x2f5   : > { %v1412_v2 = vadd.f32 %v1410_v60, %v1322_v58 }
 0x2f6   : > { %v1413_v0 = vadd.f32 %v1411_v1, %v1323_v63 }
 0x2f7   : > { %v1495_v5 = vpop.f32.mrb[8].mxu1 }
 0x2f8   : > { %v1500_v6 = vmul.f32 %v1495_v5, %v2439_v20  ;;  %v1497_v7 = vpop.f32.mrb[9].mxu1 }
 0x2f9   : > { %v1501_v8 = vmul.f32 %v1497_v7, %v2436_v19 }
 0x2fa   : > { %v1502_v29 = vadd.f32 %v1500_v6, %v1412_v2 }
 0x2fb   : > { %v1503_v11 = vadd.f32 %v1501_v8, %v1413_v0  ;;  %v1585_v12 = vpop.f32.mrb[10].mxu1 }
 0x2fc   : > { %v1590_v3 = vmul.f32 %v1585_v12, %v2442_v21  ;;  %v1587_v15 = vpop.f32.mrb[11].mxu1 }
 0x2fd   : > { %v1591_v46 = vmul.f32 %v1587_v15, %v2433_v18 }
 0x2fe   : > { %v1592_v16 = vadd.f32 %v1590_v3, %v1502_v29 }
 0x2ff   : > { %v1593_v4 = vadd.f32 %v1591_v46, %v1503_v11  ;;  %v1663_v17 = vpop.f32.mrb[12].mxu1 }
 0x300   : > { %v1668_v45 = vmul.f32 %v1663_v17, %v2472_v40  ;;  %v1665_v30 = vpop.f32.mrb[13].mxu1 }
 0x301   : > { %v1669_v22 = vmul.f32 %v1665_v30, %v2445_v24 }
 0x302   : > { %v1670_v20 = vadd.f32 %v1668_v45, %v1592_v16 }
 0x303   : > { %v1671_v23 = vadd.f32 %v1669_v22, %v1593_v4  ;;  %v1753_v9 = vpop.f32.mrb[14].mxu1 }
 0x304   : > { %v1758_v19 = vmul.f32 %v1753_v9, %v2509_v59  ;;  %v1755_v26 = vpop.f32.mrb[15].mxu1 }
 0x305   : > { %v1759_v27 = vmul.f32 %v1755_v26, %v2475_v41 }
 0x306   : > { %v1760_v21 = vadd.f32 %v1758_v19, %v1670_v20 }
 0x307   : > { %v1761_v14 = vadd.f32 %v1759_v27, %v1671_v23  ;;  %v1843_v31 = vpop.f32.mrb[16].mxu1 }
 0x308   : > { %v1848_v18 = vmul.f32 %v1843_v31, %v2555_v25  ;;  %v1845_v32 = vpop.f32.mrb[17].mxu1 }
 0x309   : > { %v1849_v33 = vmul.f32 %v1845_v32, %v2517_v62 }
 0x30a   : > { %v1850_v40 = vadd.f32 %v1848_v18, %v1760_v21 }
 0x30b   : > { %v1851_v34 = vadd.f32 %v1849_v33, %v1761_v14  ;;  %v1933_v24 = vpop.f32.mrb[18].mxu1 }
 0x30c   : > { %v1938_v35 = vmul.f32 %v1933_v24, %v2588_v36  ;;  %v1935_v37 = vpop.f32.mrb[19].mxu1 }
 0x30d   : > { %v1939_v59 = vmul.f32 %v1935_v37, %v2563_v28 }
 0x30e   : > { %v1940_v39 = vadd.f32 %v1938_v35, %v1850_v40 }
 0x30f   : > { %v1941_v42 = vadd.f32 %v1939_v59, %v1851_v34  ;;  %v2023_v41 = vpop.f32.mrb[20].mxu1 }
 0x310   : > { %v2028_v13 = vmul.f32 %v2615_v47, %v2023_v41  ;;  %v2025_v43 = vpop.f32.mrb[21].mxu1 }
 0x311   : > { %v2029_v25 = vmul.f32 %v2596_v38, %v2025_v43 }
 0x312   : > { %v2030_v44 = vadd.f32 %v2028_v13, %v1940_v39 }
 0x313   : > { %v2031_v62 = vadd.f32 %v2029_v25, %v1941_v42 }
 0x314   : > { %v2037_v49 = vadd.f32 %v2035_v48, %v2030_v44 }
 0x315   : > { %v2038_v50 = vadd.f32 %v2035_v48, %v2031_v62 }
 0x317   : > { %v2041_v36 = vcombine.low %v2037_v49, %v2038_v50 }
 0x319   : > { %2043 = vst [vmem:[%s251_s7] sm:$0x77] %v2041_v36 }
 0x31a PF: > { %s16_s21 = sadd.s32 1, %s2316_s21  }
 0x31b   : > { %p13_p4 = scmp.ge.s32.totalorder %s16_s21, 4  }
 0x31d   :  { %15 = sbr.rel (!%p13_p4) target bundleno = 1 (0x1), region = 74 }

</bundles_post_ra>
